<compile_context>
chip_gen: v6e
topology: v6e:2x2x1
jax: 0.10.0
libtpu: 0.0.40
codegen_flags: <defaults>
</compile_context>

<pallas_src>
import jax
import jax.numpy as jnp
from jax.experimental import pallas as pl
from jax.experimental.pallas import tpu as pltpu

THRESHOLD = -0.25
MEAN_SHIFT = -0.03
_SHIFT = THRESHOLD - MEAN_SHIFT  # -0.22

_LANES = 128
_MIB = 1024 * 1024


def _trelu_kernel(x_ref, o_ref):
    x = x_ref[...]
    shift = jnp.asarray(_SHIFT, dtype=x.dtype)
    o_ref[...] = jnp.maximum(x, 0) + shift


def _sublane_align(dtype) -> int:
    # f32 packs 8 rows per vreg tile, bf16 16, int8/fp8 32.
    itemsize = jnp.dtype(dtype).itemsize
    return max(8, (4 // max(itemsize, 1)) * 8)


def _num_tensorcores() -> int:
    # v7x has 2 TensorCores per chip; v5e/v6e have 1.
    try:
        kind = jax.devices()[0].device_kind.lower()
    except Exception:
        return 1
    return 2 if "v7" in kind else 1


def trelu(x: jax.Array, *, target_block_bytes: int = 6 * _MIB,
          donate_input: bool = False) -> jax.Array:
    """Elementwise TReLU. Accepts any shape (e.g. NCHW); preserves shape/dtype."""
    orig_shape = x.shape
    dtype = x.dtype
    if not jnp.issubdtype(dtype, jnp.floating):
        # The PyTorch formula adds a float constant; integer dtypes would
        # silently truncate the shift to 0 (plain relu), so refuse them.
        raise TypeError("trelu is defined for floating dtypes only")
    total = x.size
    if total == 0:
        return x

    itemsize = jnp.dtype(dtype).itemsize
    sublane = _sublane_align(dtype)

    # Build the lane-dense 2D slab. Common case: free reshape, no padding.
    if total % _LANES == 0:
        rows = total // _LANES
        x2d = jnp.reshape(x, (rows, _LANES))
        padded = False
    else:
        # Ragged tail: pad only to the next multiple of 128 lanes; the
        # sublane-partial final block is masked by Pallas (cdiv grid).
        # TODO(synk): for large ragged inputs the pad + output slice each cost
        # an extra HBM pass; prefer the fused plain-jnp path in that regime.
        padded_total = ((total + _LANES - 1) // _LANES) * _LANES
        x2d = jnp.reshape(
            jnp.pad(jnp.reshape(x, (-1,)), (0, padded_total - total)),
            (padded_total // _LANES, _LANES),
        )
        rows = padded_total // _LANES
        padded = True

    # Block rows: ~target_block_bytes per block, aligned to the dtype's
    # sublane tiling. Partial final block handled by Pallas (cdiv grid).
    max_tile_rows = max(
        sublane, (target_block_bytes // (_LANES * itemsize)) // sublane * sublane
    )

    num_tc = _num_tensorcores()
    if rows <= max_tile_rows:
        block_bytes = rows * _LANES * itemsize
        if (num_tc >= 2 and rows % sublane == 0 and rows >= 2 * sublane
                and block_bytes >= (1 << 20)):
            # Dual-TC chip (v7x) with a single large block: split into 2
            # aligned "parallel" steps so both TensorCores stream.
            tile_rows = pl.cdiv(rows, 2 * sublane) * sublane
        else:
            tile_rows = rows  # full-dim block (legal even if not sublane-aligned)
    else:
        tile_rows = max_tile_rows

    grid = (pl.cdiv(rows, tile_rows),)

    block_bytes = tile_rows * _LANES * itemsize
    # Live VMEM ~ 4x block (in + out, double-buffered) + internal scratch.
    # Cap below v7x's 64 MiB physical VMEM; raise above v5e's 16 MiB default.
    vmem_limit = int(min(56 * _MIB, max(32 * _MIB, 4 * block_bytes + 16 * _MIB)))

    cost = pl.CostEstimate(
        flops=2 * rows * _LANES,
        transcendentals=0,
        bytes_accessed=2 * rows * _LANES * itemsize,
    )

    io_aliases = {0: 0} if donate_input else {}
    # Let an elementwise producer fuse into this call's input DMA (only when
    # the input buffer is not being aliased in-place).
    allow_fusion = None if donate_input else [True]

    out2d = pl.pallas_call(
        _trelu_kernel,
        out_shape=jax.ShapeDtypeStruct((rows, _LANES), dtype),
        grid_spec=pltpu.PrefetchScalarGridSpec(
            num_scalar_prefetch=0,
            grid=grid,
            in_specs=[pl.BlockSpec((tile_rows, _LANES), lambda i: (i, 0))],
            out_specs=pl.BlockSpec((tile_rows, _LANES), lambda i: (i, 0)),
        ),
        compiler_params=pltpu.CompilerParams(
            dimension_semantics=("parallel",),
            vmem_limit_bytes=vmem_limit,
            allow_input_fusion=allow_fusion,
        ),
        cost_estimate=cost,
        input_output_aliases=io_aliases,
    )(x2d)

    if padded:
        return jnp.reshape(jnp.reshape(out2d, (-1,))[:total], orig_shape)
    return jnp.reshape(out2d, orig_shape)


def trelu_ref(x: jax.Array) -> jax.Array:
    return jnp.maximum(x, 0) + jnp.asarray(_SHIFT, dtype=x.dtype)


if __name__ == "__main__":
    key = jax.random.PRNGKey(0)

    # Main check: NCHW input, same convention as the PyTorch module.
    x = jax.random.normal(key, (2, 4, 16, 16), dtype=jnp.float32)
    out = jax.block_until_ready(trelu(x))
    ref = trelu_ref(x)
    assert out.shape == x.shape and out.dtype == x.dtype
    assert jnp.allclose(out, ref, atol=1e-6, rtol=1e-6)

    # Aliased (donate) path: in-place style output buffer reuse.
    out_alias = jax.block_until_ready(trelu(x, donate_input=True))
    assert jnp.allclose(out_alias, ref, atol=1e-6, rtol=1e-6)

    # bf16 dtype path.
    kb, kr = jax.random.split(key)
    xb = jax.random.normal(kb, (2, 4, 8, 16), dtype=jnp.bfloat16)
    outb = jax.block_until_ready(trelu(xb))
    assert outb.shape == xb.shape and outb.dtype == xb.dtype
    assert jnp.allclose(outb.astype(jnp.float32),
                        trelu_ref(xb).astype(jnp.float32), atol=1e-2, rtol=1e-2)

    # Ragged (padding / masked final block) path.
    xr = jax.random.normal(kr, (3, 5, 7), dtype=jnp.float32)  # size not % 128
    outr = jax.block_until_ready(trelu(xr))
    assert outr.shape == xr.shape
    assert jnp.allclose(outr, trelu_ref(xr), atol=1e-6, rtol=1e-6)

    print("KERNEL_OK")
</pallas_src>

<mosaic_0001>
module attributes {stable_mosaic.version = 11 : i64} {
  func.func @_trelu_kernel(%arg0: i32, %arg1: memref<16x128xf32, #tpu.memory_space<vmem>>, %arg2: memref<16x128xf32, #tpu.memory_space<vmem>>) attributes {dimension_semantics = [#tpu.dimension_semantics<parallel>], iteration_bounds = array<i64: 1>, scalar_prefetch = 0 : i64, scratch_operands = 0 : i64, tpu.core_type = #tpu.core_type<tc>, window_params = [{transform_indices = @transform_0, window_bounds = array<i64: 16, 128>}, {transform_indices = @transform_1, window_bounds = array<i64: 16, 128>}]} {
    %c0 = arith.constant 0 : index
    %c0_0 = arith.constant 0 : index
    %0 = vector.load %arg1[%c0, %c0_0] : memref<16x128xf32, #tpu.memory_space<vmem>>, vector<16x128xf32>
    %cst = arith.constant 0.000000e+00 : f32
    %1 = vector.broadcast %cst : f32 to vector<16x128xf32>
    %2 = arith.maximumf %0, %1 : vector<16x128xf32>
    %cst_1 = arith.constant -2.200000e-01 : f32
    %3 = vector.broadcast %cst_1 : f32 to vector<16x128xf32>
    %4 = arith.addf %2, %3 : vector<16x128xf32>
    %c0_2 = arith.constant 0 : index
    %c0_3 = arith.constant 0 : index
    %5 = vector.load %arg2[%c0_2, %c0_3] : memref<16x128xf32, #tpu.memory_space<vmem>>, vector<16x128xf32>
    tpu.vector_store %arg2[%c0_2, %c0_3], %4 {strides = array<i32>} : memref<16x128xf32, #tpu.memory_space<vmem>>, vector<16x128xf32>,
    return
  }
  func.func @transform_0(%arg0: i32) -> (i32, i32) {
    %c0_i32 = arith.constant 0 : i32
    %c0_i32_0 = arith.constant 0 : i32
    return %arg0, %c0_i32 : i32, i32
  }
  func.func @transform_1(%arg0: i32) -> (i32, i32) {
    %c0_i32 = arith.constant 0 : i32
    %c0_i32_0 = arith.constant 0 : i32
    return %arg0, %c0_i32 : i32, i32
  }
}

</mosaic_0001>

<bundles_post_ra>
// kernel: tpu_custom_call.1
= control target key start
LH: loop header
LB: loop body
LE: loop exit
PB: predicated region body
PF: predicated region fallthrough
CT: control target
= control target key end

     0   :  { %6 = vsyncpa [#allocation3], 0  ;;  %s116_s0 = inlined_call_operand.hbm [shape: f32[16,128], index: 0, kind: input, shape index: {}]   ;;  %s117_s1 = inlined_call_operand.hbm [shape: f32[16,128], index: 1, kind: output, shape index: {}]  }
   0x1   :  { %7 = vsyncpa [#allocation4], 0  ;;  %s96_s6 = smov [#allocation2]  }
   0x2   :  { %s13_s7 = sshll.u32 %s96_s6, 4  ;;  %s14_s7 = int_to_ptr.vmem [resolvable:$true] %s13_s7 }
   0x3   :  { %s60_s8 = scalar_lea.vmem %s14_s7, 256  ;;  %p65_p1 = scmp.lt.s32.totalorder %s14_s7, %s14_s7 }
   0x4   :  { %p61_p0 = scmp.ne.s32.totalorder %s14_s7, %s60_s8  ;;  %p66_p2 = scmp.lt.s32.totalorder %s60_s8, %s60_s8 }
   0x6   :  { %p67_p3 = por %p66_p2, %p65_p1 }
   0x8   :  { %p68_p4 = pnand %p67_p3, %p61_p0 }
   0xa   :  { %71 = shalt.err (!%p68_p4)
}
   0xb   :  { %s97_s9 = smov 128   ;;  %s98_s10 = smov 8  }
   0xc   :  { %19 = dma.hbm_to_vmem [thread:$0]  %s116_s0, 256, %s14_s7, [#allocation3], %s97_s9, %s97_s9, %s98_s10  }
   0xd   :  { %92 = dma.done.wait [#allocation3], 256  }
   0xe   :  { %93 = vsyncadd [#allocation3], 4294967040  ;;  %v23_v0 = vld [vmem:[#allocation2] sm:$0xff]  ;;  %v24_v1 = vld [vmem:[#allocation2 + $0x8] sm:$0xff]  ;;  %s99_s13 = smov [#allocation5]  }
   0xf   :  { %s36_s14 = sshll.u32 %s99_s13, 4  ;;  %v25_v2 = vmax.f32 %v23_v0, 0.0  ;;  %v26_v3 = vmax.f32 %v24_v1, 0.0  ;;  %s37_s14 = int_to_ptr.vmem [resolvable:$true] %s36_s14 }
  0x10   :  { %s72_s15 = scalar_lea.vmem %s37_s14, 256  ;;  %p77_p6 = scmp.lt.s32.totalorder %s37_s14, %s37_s14 }
  0x11   :  { %v27_v4 = vadd.f32 -0.22, %v25_v2  ;;  %v28_v5 = vadd.f32 -0.22, %v26_v3  ;;  %p73_p5 = scmp.ne.s32.totalorder %s37_s14, %s72_s15  ;;  %p78_p7 = scmp.lt.s32.totalorder %s72_s15, %s72_s15 }
  0x13   :  { %29 = vst [vmem:[#allocation5] sm:$0xff] %v27_v4  ;;  %30 = vst [vmem:[#allocation5 + $0x8] sm:$0xff] %v28_v5  ;;  %p79_p8 = por %p78_p7, %p77_p6 }
  0x15   :  { %p80_p9 = pnand %p79_p8, %p73_p5 }
  0x17   :  { %83 = shalt.err (!%p80_p9)
}
  0x18   :  { %42 = dma.vmem_to_hbm [thread:$0]  %s37_s14, 256, %s117_s1, [#allocation4], %s97_s9, %s97_s9, %s98_s10  }
  0x19   :  { %94 = dma.done.wait [#allocation4], 256  }
  0x1a   :  { %95 = vsyncadd [#allocation4], 4294967040 }
  0x1b   :  { %46 = vsyncpa [#allocation3], 1 }
  0x1c   :  { %47 = vsyncpa [#allocation4], 1 }

</bundles_post_ra>
